<compile_context>
chip_gen: v6e
topology: v6e:2x2x1
jax: 0.10.0
libtpu: 0.0.40
codegen_flags: <defaults>
</compile_context>

<pallas_src>
import functools
import math

import jax
import jax.numpy as jnp
from jax import lax
from jax.experimental import pallas as pl
from jax.experimental.pallas import tpu as pltpu

LANES = 128
ACC_ROWS = 32                          # rows per accumulator slab (4 f32 vregs)
MAX_BLOCK_ROWS = 16384                 # hard row cap per streamed tile
TARGET_STEP_BYTES = 8 * 1024 * 1024    # ~8 MiB of input (both operands) per grid step
VMEM_LIMIT_BYTES = 32 * 1024 * 1024    # explicit: > v5e's 16 MiB scoped default, <= v7x physical
CHUNK_UNROLL = 8


def _num_tensorcores():
    """Best-effort TensorCore count: 2 on v7x, 1 on v5e/v6e/unknown."""
    try:
        kind = jax.devices()[0].device_kind.lower()
    except Exception:
        return 1
    return 2 if "v7" in kind else 1


def _dice_sums_kernel(logit_ref, label_ref, acc_ref, *,
                      block_rows, blocks_per_core, rows_valid,
                      need_mask, core_split):
    """Accumulate elementwise partials of sum(logit*bin(label)), sum(logit), sum(bin(label)).

    acc_ref is a resident (3*ACC_ROWS, cols) f32 slab (one per core-split slot); slab k
    holds an elementwise partial of statistic k.  The cheap lane/sublane reductions happen
    exactly once in the wrapper.
    """
    if core_split > 1:
        c = pl.program_id(0)
        i = pl.program_id(1)
        logical_block = c * blocks_per_core + i      # unclamped block id
    else:
        i = pl.program_id(0)
        logical_block = i

    @pl.when(i == 0)
    def _():
        acc_ref[...] = jnp.zeros_like(acc_ref)

    cols = logit_ref.shape[1]
    n_full = block_rows // ACC_ROWS                  # static: full 32-row chunks
    rem = block_rows % ACC_ROWS                      # static: ragged tail chunk (0 for big blocks)
    base_row = logical_block * block_rows            # logical first row of this block

    def accumulate(masked):
        # `masked` is a static Python bool: the iota/compare/select work is only compiled
        # into (and executed by) the edge / clamped-duplicate block branch.

        def stats(r0, nrows, row_iota):
            x = logit_ref[pl.ds(r0, nrows), :].astype(jnp.float32)
            lab_bin = (label_ref[pl.ds(r0, nrows), :] != 0).astype(jnp.float32)
            if masked:
                valid = (base_row + r0 + row_iota) < rows_valid
                # Mask x itself before the product: edge-block padding may be stale NaN/Inf.
                x = jnp.where(valid, x, 0.0)
                lab_bin = jnp.where(valid, lab_bin, 0.0)
            return x * lab_bin, x, lab_bin

        if n_full > 0:
            row_iota = (lax.broadcasted_iota(jnp.int32, (ACC_ROWS, cols), 0)
                        if masked else None)         # hoisted out of the loop

            def body(k, carry):
                s_prod, s_logit, s_label = carry
                r0 = pl.multiple_of(k * ACC_ROWS, ACC_ROWS)
                d_prod, d_logit, d_label = stats(r0, ACC_ROWS, row_iota)
                return s_prod + d_prod, s_logit + d_logit, s_label + d_label

            init = (jnp.zeros((ACC_ROWS, cols), jnp.float32),
                    jnp.zeros((ACC_ROWS, cols), jnp.float32),
                    jnp.zeros((ACC_ROWS, cols), jnp.float32))
            s_prod, s_logit, s_label = lax.fori_loop(
                0, n_full, body, init, unroll=min(CHUNK_UNROLL, n_full))
            acc_ref[0:ACC_ROWS, :] += s_prod
            acc_ref[ACC_ROWS:2 * ACC_ROWS, :] += s_logit
            acc_ref[2 * ACC_ROWS:3 * ACC_ROWS, :] += s_label

        if rem > 0:
            r0 = n_full * ACC_ROWS
            row_iota = (lax.broadcasted_iota(jnp.int32, (rem, cols), 0)
                        if masked else None)
            d_prod, d_logit, d_label = stats(r0, rem, row_iota)
            acc_ref[0:rem, :] += d_prod
            acc_ref[ACC_ROWS:ACC_ROWS + rem, :] += d_logit
            acc_ref[2 * ACC_ROWS:2 * ACC_ROWS + rem, :] += d_label

    if need_mask:
        block_full = (base_row + block_rows) <= rows_valid
        pl.when(block_full)(lambda: accumulate(False))                    # fast bulk path
        pl.when(jnp.logical_not(block_full))(lambda: accumulate(True))    # edge / duplicate
    else:
        accumulate(False)


def binary_dice_loss(logit, label, ignore_index=None, *,
                     max_block_rows=MAX_BLOCK_ROWS, core_split=None):
    """Matches BinaryDiceLoss.forward: returns (loss, [stop_gradient(loss)])."""
    assert logit.shape[1] == 1
    assert logit.shape == label.shape
    del ignore_index  # stored by the reference module but unused in its forward

    n = math.prod(logit.shape)
    assert n > 0

    # Keep native dtypes (no f32 upcast pass over HBM).  bool labels become int8 with a
    # cheap 1-byte/elem convert so the kernel only sees arithmetic dtypes.
    if label.dtype == jnp.bool_:
        label = label.astype(jnp.int8)

    # Copy-free 2-D factorization: a plain reshape (bitcast), never a pad/concat copy.
    if n % LANES == 0:
        cols = LANES                          # lane-dense: the common large-input case
    elif logit.shape[-1] <= 2048:
        cols = logit.shape[-1]                # natural last dim; partial lanes, same HBM bytes
    else:
        cols = 0                              # rare awkward shape -> padded fallback below
    if cols and n % cols == 0:
        rows = n // cols
        logit2 = jnp.reshape(logit, (rows, cols))
        label2 = jnp.reshape(label, (rows, cols))
    else:
        # TODO(synk): huge non-lane-aligned last dim; keep the (one extra copy) pad fallback.
        cols = LANES
        rows = pl.cdiv(n, LANES)
        pad = rows * LANES - n
        lf = jnp.reshape(logit, (-1,))
        bf = jnp.reshape(label, (-1,))
        logit2 = jnp.concatenate([lf, jnp.zeros((pad,), lf.dtype)]).reshape(rows, LANES)
        label2 = jnp.concatenate([bf, jnp.zeros((pad,), bf.dtype)]).reshape(rows, LANES)

    # Tile rows so each grid step streams ~TARGET_STEP_BYTES of input (amortizing the
    # ~0.35us/step overhead), capped and kept a multiple of ACC_ROWS.
    step_bytes_per_row = cols * (logit2.dtype.itemsize + label2.dtype.itemsize)
    target_rows = max(ACC_ROWS,
                      (TARGET_STEP_BYTES // step_bytes_per_row) // ACC_ROWS * ACC_ROWS)
    row_cap = max(ACC_ROWS, (min(max_block_rows, target_rows) // ACC_ROWS) * ACC_ROWS)

    if rows % ACC_ROWS == 0:
        block_rows = min(row_cap, rows)
    elif rows > row_cap:
        block_rows = row_cap                  # ragged edge block handled by the in-kernel mask
    else:
        block_rows = rows                     # equals the full dim -> always a legal block shape

    num_blocks = pl.cdiv(rows, block_rows)

    if core_split is None:
        core_split = _num_tensorcores()
    core_split = max(1, min(int(core_split), 2, num_blocks))

    blocks_per_core = pl.cdiv(num_blocks, core_split) if core_split > 1 else num_blocks
    need_mask = (rows % block_rows != 0) or (core_split * blocks_per_core > num_blocks)

    kernel = functools.partial(
        _dice_sums_kernel,
        block_rows=block_rows,
        blocks_per_core=blocks_per_core,
        rows_valid=rows,
        need_mask=need_mask,
        core_split=core_split,
    )

    if core_split > 1:
        grid = (core_split, blocks_per_core)

        def in_index(c, i):
            # Clamp so trailing slots never index past the last block; the (duplicate)
            # block's contribution is masked to zero in-kernel.
            return (jnp.minimum(c * blocks_per_core + i, num_blocks - 1), 0)

        out_spec = pl.BlockSpec((None, 3 * ACC_ROWS, cols), lambda c, i: (c, 0, 0))
        out_shape = jax.ShapeDtypeStruct((core_split, 3 * ACC_ROWS, cols), jnp.float32)
        dim_sem = (getattr(pltpu, "CORE_PARALLEL", "parallel"), pltpu.ARBITRARY)
    else:
        grid = (num_blocks,)
        in_index = lambda i: (i, 0)
        out_spec = pl.BlockSpec((3 * ACC_ROWS, cols), lambda i: (0, 0))
        out_shape = jax.ShapeDtypeStruct((3 * ACC_ROWS, cols), jnp.float32)
        dim_sem = (pltpu.ARBITRARY,)

    in_bytes = n * (logit2.dtype.itemsize + label2.dtype.itemsize)
    cost = pl.CostEstimate(flops=6 * n, transcendentals=0,
                           bytes_accessed=in_bytes + core_split * 3 * ACC_ROWS * cols * 4)

    acc = pl.pallas_call(
        kernel,
        out_shape=out_shape,
        grid_spec=pltpu.PrefetchScalarGridSpec(
            num_scalar_prefetch=0,
            grid=grid,
            in_specs=[pl.BlockSpec((block_rows, cols), in_index),
                      pl.BlockSpec((block_rows, cols), in_index)],
            out_specs=out_spec,
        ),
        compiler_params=pltpu.CompilerParams(
            dimension_semantics=dim_sem,
            vmem_limit_bytes=VMEM_LIMIT_BYTES,
        ),
        cost_estimate=cost,
    )(logit2, label2)

    if core_split > 1:
        acc = jnp.sum(acc, axis=0)            # combine per-core slabs
    s_prod = jnp.sum(acc[0:ACC_ROWS, :])
    s_logit = jnp.sum(acc[ACC_ROWS:2 * ACC_ROWS, :])
    s_label = jnp.sum(acc[2 * ACC_ROWS:3 * ACC_ROWS, :])

    loss = -(2.0 * s_prod + 0.0001) / (s_logit + s_label + 0.0001)
    return loss, [lax.stop_gradient(loss)]


def _reference(logit, label):
    """Pure-JAX replica of BinaryDiceLoss.forward for verification."""
    lab = (label != 0).astype(jnp.float32)
    x = logit.astype(jnp.float32)
    return -(2.0 * jnp.sum(x * lab) + 0.0001) / (jnp.sum(x) + jnp.sum(lab) + 0.0001)


if __name__ == "__main__":
    key = jax.random.PRNGKey(0)

    # (shape, logit dtype, label dtype, max_block_rows override):
    #  - (2,1,16,16)  f32/f32 : single tiny block, remainder-chunk path.
    #  - (2,1,64,64)  bf16/i8 : native narrow dtypes, multi-block fori path.
    #  - (2,1,80,80)  f32/bool: ragged edge block -> gated mask path.
    #  - (2,1,30,33)  f32/f32 : n not lane-aligned -> natural-last-dim (33-lane) path.
    cases = [
        ((2, 1, 16, 16), jnp.float32, jnp.float32, None),
        ((2, 1, 64, 64), jnp.bfloat16, jnp.int8, 32),
        ((2, 1, 80, 80), jnp.float32, jnp.bool_, 32),
        ((2, 1, 30, 33), jnp.float32, jnp.float32, None),
    ]

    for shape, ldt, bdt, mbr in cases:
        key, k_logit, k_label = jax.random.split(key, 3)
        logit = jax.random.uniform(k_logit, shape, dtype=jnp.float32).astype(ldt)
        mask = jax.random.bernoulli(k_label, p=0.4, shape=shape)
        if bdt == jnp.bool_:
            label = mask
        else:
            # non-{0,1} positive labels exercise the label.bool() semantics
            label = (mask.astype(jnp.float32) * 3.0).astype(bdt)

        kwargs = {} if mbr is None else {"max_block_rows": mbr}
        loss, aux = binary_dice_loss(logit, label, **kwargs)
        loss = jax.block_until_ready(loss)

        want = _reference(logit, label)
        assert jnp.allclose(loss, want, rtol=1e-4, atol=1e-6), (shape, loss, want)
        assert jnp.allclose(aux[0], want, rtol=1e-4, atol=1e-6), (shape, aux[0], want)

    print("KERNEL_OK")
</pallas_src>

<mosaic_0001>
module attributes {stable_mosaic.version = 11 : i64} {
  func.func @_dice_sums_kernel(%arg0: i32, %arg1: memref<4x128xf32, #tpu.memory_space<vmem>>, %arg2: memref<4x128xf32, #tpu.memory_space<vmem>>, %arg3: memref<96x128xf32, #tpu.memory_space<vmem>>) attributes {dimension_semantics = [#tpu.dimension_semantics<arbitrary>], iteration_bounds = array<i64: 1>, scalar_prefetch = 0 : i64, scratch_operands = 0 : i64, tpu.core_type = #tpu.core_type<tc>, window_params = [{transform_indices = @transform_0, window_bounds = array<i64: 4, 128>}, {transform_indices = @transform_1, window_bounds = array<i64: 4, 128>}, {pipeline_mode = #tpu.pipeline_mode<synchronous>, transform_indices = @transform_2, window_bounds = array<i64: 96, 128>}]} {
    %c0_i32 = arith.constant 0 : i32
    %0 = arith.cmpi eq, %arg0, %c0_i32 : i32
    %1 = arith.extui %0 : i1 to i32
    %c0_i32_0 = arith.constant 0 : i32
    %2 = arith.cmpi ne, %1, %c0_i32_0 : i32
    scf.if %2 {
      %cst_14 = arith.constant 0.000000e+00 : f32
      %19 = vector.broadcast %cst_14 : f32 to vector<96x128xf32>
      %c0_15 = arith.constant 0 : index
      %c0_16 = arith.constant 0 : index
      %20 = vector.load %arg3[%c0_15, %c0_16] : memref<96x128xf32, #tpu.memory_space<vmem>>, vector<96x128xf32>
      tpu.vector_store %arg3[%c0_15, %c0_16], %19 {strides = array<i32>} : memref<96x128xf32, #tpu.memory_space<vmem>>, vector<96x128xf32>,
    } else {
    }
    %c0 = arith.constant 0 : index
    %c0_1 = arith.constant 0 : index
    %3 = vector.load %arg1[%c0, %c0_1] : memref<4x128xf32, #tpu.memory_space<vmem>>, vector<4x128xf32>
    %c0_2 = arith.constant 0 : index
    %c0_3 = arith.constant 0 : index
    %4 = vector.load %arg2[%c0_2, %c0_3] : memref<4x128xf32, #tpu.memory_space<vmem>>, vector<4x128xf32>
    %cst = arith.constant 0.000000e+00 : f32
    %5 = vector.broadcast %cst : f32 to vector<4x128xf32>
    %6 = arith.cmpf one, %4, %5 : vector<4x128xf32>
    %7 = arith.extui %6 : vector<4x128xi1> to vector<4x128xi32>
    %8 = arith.sitofp %7 : vector<4x128xi32> to vector<4x128xf32>
    %9 = arith.mulf %3, %8 : vector<4x128xf32>
    %c0_4 = arith.constant 0 : index
    %c0_5 = arith.constant 0 : index
    %10 = vector.load %arg3[%c0_4, %c0_5] : memref<96x128xf32, #tpu.memory_space<vmem>>, vector<4x128xf32>
    %11 = arith.addf %10, %9 : vector<4x128xf32>
    %c0_6 = arith.constant 0 : index
    %c0_7 = arith.constant 0 : index
    %12 = vector.load %arg3[%c0_6, %c0_7] : memref<96x128xf32, #tpu.memory_space<vmem>>, vector<4x128xf32>
    tpu.vector_store %arg3[%c0_6, %c0_7], %11 {strides = array<i32>} : memref<96x128xf32, #tpu.memory_space<vmem>>, vector<4x128xf32>,
    %c32 = arith.constant 32 : index
    %c0_8 = arith.constant 0 : index
    %13 = vector.load %arg3[%c32, %c0_8] : memref<96x128xf32, #tpu.memory_space<vmem>>, vector<4x128xf32>
    %14 = arith.addf %13, %3 : vector<4x128xf32>
    %c32_9 = arith.constant 32 : index
    %c0_10 = arith.constant 0 : index
    %15 = vector.load %arg3[%c32_9, %c0_10] : memref<96x128xf32, #tpu.memory_space<vmem>>, vector<4x128xf32>
    tpu.vector_store %arg3[%c32_9, %c0_10], %14 {strides = array<i32>} : memref<96x128xf32, #tpu.memory_space<vmem>>, vector<4x128xf32>,
    %c64 = arith.constant 64 : index
    %c0_11 = arith.constant 0 : index
    %16 = vector.load %arg3[%c64, %c0_11] : memref<96x128xf32, #tpu.memory_space<vmem>>, vector<4x128xf32>
    %17 = arith.addf %16, %8 : vector<4x128xf32>
    %c64_12 = arith.constant 64 : index
    %c0_13 = arith.constant 0 : index
    %18 = vector.load %arg3[%c64_12, %c0_13] : memref<96x128xf32, #tpu.memory_space<vmem>>, vector<4x128xf32>
    tpu.vector_store %arg3[%c64_12, %c0_13], %17 {strides = array<i32>} : memref<96x128xf32, #tpu.memory_space<vmem>>, vector<4x128xf32>,
    return
  }
  func.func @transform_0(%arg0: i32) -> (i32, i32) {
    %c0_i32 = arith.constant 0 : i32
    %c0_i32_0 = arith.constant 0 : i32
    return %arg0, %c0_i32 : i32, i32
  }
  func.func @transform_1(%arg0: i32) -> (i32, i32) {
    %c0_i32 = arith.constant 0 : i32
    %c0_i32_0 = arith.constant 0 : i32
    return %arg0, %c0_i32 : i32, i32
  }
  func.func @transform_2(%arg0: i32) -> (i32, i32) {
    %c0_i32 = arith.constant 0 : i32
    %c0_i32_0 = arith.constant 0 : i32
    %c0_i32_1 = arith.constant 0 : i32
    return %c0_i32, %c0_i32_0 : i32, i32
  }
}

</mosaic_0001>

<bundles_post_ra>
// kernel: tpu_custom_call.1
= control target key start
LH: loop header
LB: loop body
LE: loop exit
PB: predicated region body
PF: predicated region fallthrough
CT: control target
= control target key end

     0   :  { %7 = vsyncpa [#allocation3], 0  ;;  %s188_s0 = inlined_call_operand.hbm [shape: f32[4,128], index: 0, kind: input, shape index: {}]   ;;  %s189_s1 = inlined_call_operand.hbm [shape: f32[4,128], index: 1, kind: input, shape index: {}]   ;;  %s190_s2 = inlined_call_operand.hbm [shape: f32[96,128], index: 2, kind: output, shape index: {}]  }
   0x1   :  { %8 = vsyncpa [#allocation6], 0 }
   0x2   :  { %9 = vsyncpa [#allocation4], 0  ;;  %s158_s9 = smov [#allocation2]   ;;  %s159_s11 = smov [#allocation5]  }
   0x3   :  { %s16_s10 = sshll.u32 %s158_s9, 4  ;;  %s26_s12 = sshll.u32 %s159_s11, 4  ;;  %s17_s10 = int_to_ptr.vmem [resolvable:$true] %s16_s10  ;;  %s27_s12 = int_to_ptr.vmem [resolvable:$true] %s26_s12 }
   0x4   :  { %s100_s13 = scalar_lea.vmem %s17_s10, 64  ;;  %p105_p1 = scmp.lt.s32.totalorder %s17_s10, %s17_s10 }
   0x5   :  { %p101_p0 = scmp.ne.s32.totalorder %s17_s10, %s100_s13  ;;  %p106_p2 = scmp.lt.s32.totalorder %s100_s13, %s100_s13 }
   0x7   :  { %p107_p3 = por %p106_p2, %p105_p1 }
   0x9   :  { %p108_p4 = pnand %p107_p3, %p101_p0 }
   0xb   :  { %111 = shalt.err (!%p108_p4)
}
   0xc   :  { %19 = dma.hbm_to_vmem [thread:$0]  %s188_s0, 64, %s17_s10, [#allocation3]  }
   0xd   :  { %s120_s16 = scalar_lea.vmem %s27_s12, 64  ;;  %p125_p6 = scmp.lt.s32.totalorder %s27_s12, %s27_s12 }
   0xe   :  { %p121_p5 = scmp.ne.s32.totalorder %s27_s12, %s120_s16  ;;  %p126_p7 = scmp.lt.s32.totalorder %s120_s16, %s120_s16 }
  0x10   :  { %p127_p8 = por %p126_p7, %p125_p6 }
  0x12   :  { %p128_p9 = pnand %p127_p8, %p121_p5 }
  0x14   :  { %131 = shalt.err (!%p128_p9)
}
  0x15   :  { %29 = dma.hbm_to_vmem [thread:$0]  %s189_s1, 64, %s27_s12, [#allocation6]  }
  0x16   :  { %152 = dma.done.wait [#allocation3], 64  }
  0x17   :  { %153 = vsyncadd [#allocation3], 4294967232 }
  0x18   :  { %154 = dma.done.wait [#allocation6], 64  }
  0x19   :  { %155 = vsyncadd [#allocation6], 4294967232  ;;  %v160_v0 = vmov 0.0   ;;  %v52_v1 = vld [vmem:[#allocation2] sm:$0xf]  ;;  %s161_s0 = smov [#allocation7]  }
  0x1a   :  { %40 = vst [vmem:[#allocation7] sm:$0xff] %v160_v0  ;;  %41 = vst [vmem:[#allocation7 + $0x8] sm:$0xff] %v160_v0  ;;  %v53_v2 = vld [vmem:[#allocation5] sm:$0xf]  ;;  %s72_s1 = sshll.u32 %s161_s0, 4  ;;  %s73_s1 = int_to_ptr.vmem [resolvable:$true] %s72_s1 }
  0x1b   :  { %42 = vst [vmem:[#allocation7 + $0x10] sm:$0xff] %v160_v0  ;;  %43 = vst [vmem:[#allocation7 + $0x18] sm:$0xff] %v160_v0  ;;  %vm54_vm0 = vcmp.ne.f32.partialorder %v53_v2, 0.0  ;;  %s132_s19 = scalar_lea.vmem %s73_s1, 1536  ;;  %p137_p11 = scmp.lt.s32.totalorder %s73_s1, %s73_s1 }
  0x1c   :  { %44 = vst [vmem:[#allocation7 + $0x20] sm:$0xff] %v160_v0  ;;  %45 = vst [vmem:[#allocation7 + $0x28] sm:$0xff] %v160_v0  ;;  %v85_v4 = vsel %vm54_vm0, 1.0, %v160_v0  ;;  %p133_p10 = scmp.ne.s32.totalorder %s73_s1, %s132_s19  ;;  %p138_p12 = scmp.lt.s32.totalorder %s132_s19, %s132_s19 }
  0x1d   :  { %46 = vst [vmem:[#allocation7 + $0x30] sm:$0xff] %v160_v0  ;;  %47 = vst [vmem:[#allocation7 + $0x38] sm:$0xff] %v160_v0  ;;  %v57_v8 = vmul.f32 %v85_v4, %v52_v1 }
  0x1e   :  { %48 = vst [vmem:[#allocation7 + $0x40] sm:$0xff] %v160_v0  ;;  %49 = vst [vmem:[#allocation7 + $0x48] sm:$0xff] %v160_v0  ;;  %p139_p13 = por %p138_p12, %p137_p11 }
  0x1f   :  { %50 = vst [vmem:[#allocation7 + $0x50] sm:$0xff] %v160_v0  ;;  %51 = vst [vmem:[#allocation7 + $0x58] sm:$0xff] %v160_v0 }
  0x20   :  { %p140_p0 = pnand %p139_p13, %p133_p10 }
  0x21   :  { %v58_v5 = vld [vmem:[#allocation7] sm:$0xf] }
  0x22   :  { %v59_v10 = vadd.f32 %v58_v5, %v57_v8 }
  0x23   :  { %v61_v3 = vld [vmem:[#allocation7 + $0x20] sm:$0xf] }
  0x24   :  { %v62_v6 = vadd.f32 %v61_v3, %v52_v1  ;;  %60 = vst [vmem:[#allocation7] sm:$0xf] %v59_v10 }
  0x25   :  { %v64_v7 = vld [vmem:[#allocation7 + $0x40] sm:$0xf] }
  0x26   :  { %v65_v9 = vadd.f32 %v85_v4, %v64_v7  ;;  %63 = vst [vmem:[#allocation7 + $0x20] sm:$0xf] %v62_v6 }
  0x28   :  { %66 = vst [vmem:[#allocation7 + $0x40] sm:$0xf] %v65_v9 }
  0x29   :  { %143 = shalt.err (!%p140_p0)
}
  0x2a   :  { %s162_s20 = smov 128   ;;  %s163_s21 = smov 8  }
  0x2b   :  { %78 = dma.vmem_to_hbm [thread:$0]  %s73_s1, 1536, %s190_s2, [#allocation4], %s162_s20, %s162_s20, %s163_s21  }
  0x2c   :  { %156 = dma.done.wait [#allocation4], 1536  }
  0x2d   :  { %157 = vsyncadd [#allocation4], 4294965760 }
  0x2e   :  { %82 = vsyncpa [#allocation3], 1 }
  0x2f   :  { %83 = vsyncpa [#allocation6], 1 }
  0x30   :  { %84 = vsyncpa [#allocation4], 1 }

</bundles_post_ra>
